<compile_context>
chip_gen: v6e
topology: v6e:2x2x1
jax: 0.10.0
libtpu: 0.0.40
codegen_flags: <defaults>
</compile_context>

<pallas_src>
import functools

import jax
import jax.numpy as jnp
from jax.experimental import pallas as pl
from jax.experimental.pallas import tpu as pltpu

EPS = 1e-5  # nn.BatchNorm2d default eps


# ------------------------------ kernels -------------------------------------

def _stats_kernel(x_ref, w_ref, g_ref, b_ref, scale_ref, shift_ref,
                  sum_ref, ssq_ref, *, m_total):
    """Pass 1: accumulate BN batch moments of y = W @ x; emit scale/shift."""
    n_i = pl.program_id(0)
    t_i = pl.program_id(1)

    @pl.when(jnp.logical_and(n_i == 0, t_i == 0))
    def _init():
        sum_ref[...] = jnp.zeros_like(sum_ref)
        ssq_ref[...] = jnp.zeros_like(ssq_ref)

    # 1x1 conv == one lane-dense MXU matmul: (Cout, Cin) @ (Cin, thw).
    y = jnp.dot(w_ref[...], x_ref[0], preferred_element_type=jnp.float32)

    # Single-pass moments (padded lanes are exact zeros -> contribute nothing).
    sum_ref[...] += jnp.sum(y, axis=1, keepdims=True)
    ssq_ref[...] += jnp.sum(y * y, axis=1, keepdims=True)

    @pl.when(jnp.logical_and(n_i == pl.num_programs(0) - 1,
                             t_i == pl.num_programs(1) - 1))
    def _finalize():
        inv_m = 1.0 / m_total
        mean = sum_ref[...] * inv_m
        var = ssq_ref[...] * inv_m - mean * mean        # biased batch variance
        scale = g_ref[...] * jax.lax.rsqrt(var + EPS)
        scale_ref[...] = scale
        shift_ref[...] = b_ref[...] - mean * scale


def _norm_kernel(x_ref, w_ref, scale_ref, shift_ref, o_ref):
    """Pass 2 (megacore-parallel): y = W @ x, fused BN affine + ReLU, store."""
    y = jnp.dot(w_ref[...], x_ref[0], preferred_element_type=jnp.float32)
    o_ref[0] = jnp.maximum(y * scale_ref[...] + shift_ref[...], 0.0)


# ------------------------------ wrapper --------------------------------------

def _round_up(a, b):
    return -(-a // b) * b


def _pick_hw_tile(cin, cout, hw, block_budget_bytes=12 << 20):
    """Lane-aligned HW tile from a VMEM byte budget (double-buffered x + out)."""
    hw_pad = _round_up(hw, 128)
    bytes_per_col = 4 * 2 * (cin + cout)          # f32, 2 pipeline buffers each
    t = max(128, (block_budget_bytes // bytes_per_col) // 128 * 128)
    t = min(t, hw_pad)
    while hw_pad % t:                             # keep tiles equal-sized
        t -= 128
    return t, hw_pad


def conv1x1_bn_relu(x_nchw, conv_w, conv_bias, gamma, beta):
    # conv bias cancels exactly under training-mode BatchNorm (batch-mean
    # subtraction), so it is intentionally not used in the kernels.
    del conv_bias
    n, cin, h, w = x_nchw.shape
    cout = conv_w.shape[0]
    hw = h * w
    m_total = float(n * hw)                       # true element count for BN

    # Free reshapes only -- no layout copies outside the kernels.
    x_flat = x_nchw.reshape(n, cin, hw).astype(jnp.float32)
    w_mat = conv_w.reshape(cout, cin).astype(jnp.float32)
    g = gamma.reshape(cout, 1).astype(jnp.float32)
    b = beta.reshape(cout, 1).astype(jnp.float32)

    thw, hw_pad = _pick_hw_tile(cin, cout, hw)
    if hw_pad != hw:
        x_flat = jnp.pad(x_flat, ((0, 0), (0, 0), (0, hw_pad - hw)))
    n_tiles = hw_pad // thw

    x_spec = pl.BlockSpec((1, cin, thw), lambda ni, ti: (ni, 0, ti))
    w_spec = pl.BlockSpec((cout, cin), lambda ni, ti: (0, 0))
    vec_spec = pl.BlockSpec((cout, 1), lambda ni, ti: (0, 0))

    # ---- pass 1: BN batch statistics -> fused scale/shift (tiny outputs) ----
    scale, shift = pl.pallas_call(
        functools.partial(_stats_kernel, m_total=m_total),
        out_shape=(jax.ShapeDtypeStruct((cout, 1), jnp.float32),
                   jax.ShapeDtypeStruct((cout, 1), jnp.float32)),
        grid_spec=pltpu.PrefetchScalarGridSpec(
            num_scalar_prefetch=0,
            grid=(n, n_tiles),
            in_specs=[x_spec, w_spec, vec_spec, vec_spec],
            out_specs=[vec_spec, vec_spec],
            scratch_shapes=[pltpu.VMEM((cout, 1), jnp.float32)] * 2),
        compiler_params=pltpu.CompilerParams(
            dimension_semantics=("arbitrary", "arbitrary"),
            vmem_limit_bytes=32 << 20),
    )(x_flat, w_mat, g, b)

    # ---- pass 2: conv + BN affine + ReLU, lane-dense stores, megacore ok ----
    out = pl.pallas_call(
        _norm_kernel,
        out_shape=jax.ShapeDtypeStruct((n, cout, hw_pad), jnp.float32),
        grid_spec=pltpu.PrefetchScalarGridSpec(
            num_scalar_prefetch=0,
            grid=(n, n_tiles),
            in_specs=[x_spec, w_spec, vec_spec, vec_spec],
            out_specs=pl.BlockSpec((1, cout, thw), lambda ni, ti: (ni, 0, ti))),
        compiler_params=pltpu.CompilerParams(
            dimension_semantics=("parallel", "parallel"),
            vmem_limit_bytes=32 << 20),
    )(x_flat, w_mat, scale, shift)

    if hw_pad != hw:
        out = out[:, :, :hw]
    return out.reshape(n, cout, h, w)


# --------------------------- pure-JAX reference ------------------------------

def _ref_forward(x, w, bias, gamma, beta):
    y = jax.lax.conv_general_dilated(
        x, w, window_strides=(1, 1), padding=((0, 0), (0, 0)),
        dimension_numbers=("NCHW", "OIHW", "NCHW"))
    y = y + bias[None, :, None, None]
    mean = jnp.mean(y, axis=(0, 2, 3), keepdims=True)
    var = jnp.mean((y - mean) ** 2, axis=(0, 2, 3), keepdims=True)
    y = ((y - mean) * jax.lax.rsqrt(var + EPS)
         * gamma[None, :, None, None] + beta[None, :, None, None])
    return jax.nn.relu(y)


# --------------------------------- main ---------------------------------------

if __name__ == "__main__":
    N, CIN, COUT, H, W = 2, 4, 8, 16, 16
    key = jax.random.PRNGKey(0)
    k_x, k_w, k_b = jax.random.split(key, 3)

    x = jax.random.normal(k_x, (N, CIN, H, W), jnp.float32)

    # Shapes match nn.Conv2d(CIN, COUT, 1) / nn.BatchNorm2d(COUT) defaults.
    w = jax.random.normal(k_w, (COUT, CIN, 1, 1), jnp.float32) * 0.1   # OIHW
    bias = jax.random.normal(k_b, (COUT,), jnp.float32) * 0.1
    gamma = jnp.ones((COUT,), jnp.float32)     # BatchNorm2d default init
    beta = jnp.zeros((COUT,), jnp.float32)

    out = conv1x1_bn_relu(x, w, bias, gamma, beta)
    out = jax.block_until_ready(out)

    ref = _ref_forward(x, w, bias, gamma, beta)
    assert out.shape == (N, COUT, H, W) and out.dtype == jnp.float32
    err = jnp.max(jnp.abs(out - ref))
    assert jnp.allclose(out, ref, atol=1e-4, rtol=1e-4), f"max abs err {err}"

    print("KERNEL_OK")
</pallas_src>

<mosaic_0001>
module attributes {stable_mosaic.version = 11 : i64} {
  func.func @_stats_kernel(%arg0: i32, %arg1: i32, %arg2: memref<1x4x256xf32, #tpu.memory_space<vmem>>, %arg3: memref<8x4xf32, #tpu.memory_space<vmem>>, %arg4: memref<8x1xf32, #tpu.memory_space<vmem>>, %arg5: memref<8x1xf32, #tpu.memory_space<vmem>>, %arg6: memref<8x1xf32, #tpu.memory_space<vmem>>, %arg7: memref<8x1xf32, #tpu.memory_space<vmem>>, %arg8: memref<8x1xf32, #tpu.memory_space<vmem>>, %arg9: memref<8x1xf32, #tpu.memory_space<vmem>>) attributes {dimension_semantics = [#tpu.dimension_semantics<arbitrary>, #tpu.dimension_semantics<arbitrary>], iteration_bounds = array<i64: 2, 1>, scalar_prefetch = 0 : i64, scratch_operands = 2 : i64, tpu.core_type = #tpu.core_type<tc>, window_params = [{transform_indices = @transform_0, window_bounds = array<i64: 1, 4, 256>}, {pipeline_mode = #tpu.pipeline_mode<synchronous>, transform_indices = @transform_1, window_bounds = array<i64: 8, 4>}, {pipeline_mode = #tpu.pipeline_mode<synchronous>, transform_indices = @transform_2, window_bounds = array<i64: 8, 1>}, {pipeline_mode = #tpu.pipeline_mode<synchronous>, transform_indices = @transform_3, window_bounds = array<i64: 8, 1>}, {pipeline_mode = #tpu.pipeline_mode<synchronous>, transform_indices = @transform_4, window_bounds = array<i64: 8, 1>}, {pipeline_mode = #tpu.pipeline_mode<synchronous>, transform_indices = @transform_5, window_bounds = array<i64: 8, 1>}]} {
    %c0_i32 = arith.constant 0 : i32
    %0 = arith.cmpi eq, %arg0, %c0_i32 : i32
    %c0_i32_0 = arith.constant 0 : i32
    %1 = arith.cmpi eq, %arg1, %c0_i32_0 : i32
    %2 = arith.andi %0, %1 : i1
    %3 = arith.extui %2 : i1 to i32
    %c0_i32_1 = arith.constant 0 : i32
    %4 = arith.cmpi ne, %3, %c0_i32_1 : i32
    scf.if %4 {
      %cst_18 = arith.constant 0.000000e+00 : f32
      %25 = vector.broadcast %cst_18 : f32 to vector<8x1xf32>
      %c0_19 = arith.constant 0 : index
      %c0_20 = arith.constant 0 : index
      %26 = vector.load %arg8[%c0_19, %c0_20] : memref<8x1xf32, #tpu.memory_space<vmem>>, vector<8x1xf32>
      tpu.vector_store %arg8[%c0_19, %c0_20], %25 {strides = array<i32>} : memref<8x1xf32, #tpu.memory_space<vmem>>, vector<8x1xf32>,
      %cst_21 = arith.constant 0.000000e+00 : f32
      %27 = vector.broadcast %cst_21 : f32 to vector<8x1xf32>
      %c0_22 = arith.constant 0 : index
      %c0_23 = arith.constant 0 : index
      %28 = vector.load %arg9[%c0_22, %c0_23] : memref<8x1xf32, #tpu.memory_space<vmem>>, vector<8x1xf32>
      tpu.vector_store %arg9[%c0_22, %c0_23], %27 {strides = array<i32>} : memref<8x1xf32, #tpu.memory_space<vmem>>, vector<8x1xf32>,
    } else {
    }
    %c0 = arith.constant 0 : index
    %c0_2 = arith.constant 0 : index
    %5 = vector.load %arg3[%c0, %c0_2] : memref<8x4xf32, #tpu.memory_space<vmem>>, vector<8x4xf32>
    %c0_3 = arith.constant 0 : index
    %c0_4 = arith.constant 0 : index
    %c0_5 = arith.constant 0 : index
    %6 = vector.load %arg2[%c0_3, %c0_4, %c0_5] : memref<1x4x256xf32, #tpu.memory_space<vmem>>, vector<1x4x256xf32>
    %7 = vector.shape_cast %6 : vector<1x4x256xf32> to vector<4x256xf32>
    %cst = arith.constant dense<0.000000e+00> : vector<8x256xf32>
    %8 = tpu.matmul %5, %7, %cst {dimension_numbers = #tpu.dot_dimension_numbers<[1], [0], [0], [1], [0, 0, 1, 1], [], []>} : vector<8x4xf32>, vector<4x256xf32>, vector<8x256xf32> -> vector<8x256xf32>
    %c0_6 = arith.constant 0 : index
    %c0_7 = arith.constant 0 : index
    %9 = vector.load %arg8[%c0_6, %c0_7] : memref<8x1xf32, #tpu.memory_space<vmem>>, vector<8x1xf32>
    %cst_8 = arith.constant dense<0.000000e+00> : vector<8xf32>
    %10 = vector.multi_reduction <add>, %8, %cst_8 [1] : vector<8x256xf32> to vector<8xf32>
    %11 = vector.shape_cast %10 : vector<8xf32> to vector<8x1xf32>
    %12 = arith.addf %9, %11 : vector<8x1xf32>
    %c0_9 = arith.constant 0 : index
    %c0_10 = arith.constant 0 : index
    %13 = vector.load %arg8[%c0_9, %c0_10] : memref<8x1xf32, #tpu.memory_space<vmem>>, vector<8x1xf32>
    tpu.vector_store %arg8[%c0_9, %c0_10], %12 {strides = array<i32>} : memref<8x1xf32, #tpu.memory_space<vmem>>, vector<8x1xf32>,
    %c0_11 = arith.constant 0 : index
    %c0_12 = arith.constant 0 : index
    %14 = vector.load %arg9[%c0_11, %c0_12] : memref<8x1xf32, #tpu.memory_space<vmem>>, vector<8x1xf32>
    %15 = arith.mulf %8, %8 : vector<8x256xf32>
    %cst_13 = arith.constant dense<0.000000e+00> : vector<8xf32>
    %16 = vector.multi_reduction <add>, %15, %cst_13 [1] : vector<8x256xf32> to vector<8xf32>
    %17 = vector.shape_cast %16 : vector<8xf32> to vector<8x1xf32>
    %18 = arith.addf %14, %17 : vector<8x1xf32>
    %c0_14 = arith.constant 0 : index
    %c0_15 = arith.constant 0 : index
    %19 = vector.load %arg9[%c0_14, %c0_15] : memref<8x1xf32, #tpu.memory_space<vmem>>, vector<8x1xf32>
    tpu.vector_store %arg9[%c0_14, %c0_15], %18 {strides = array<i32>} : memref<8x1xf32, #tpu.memory_space<vmem>>, vector<8x1xf32>,
    %c1_i32 = arith.constant 1 : i32
    %20 = arith.cmpi eq, %arg0, %c1_i32 : i32
    %c0_i32_16 = arith.constant 0 : i32
    %21 = arith.cmpi eq, %arg1, %c0_i32_16 : i32
    %22 = arith.andi %20, %21 : i1
    %23 = arith.extui %22 : i1 to i32
    %c0_i32_17 = arith.constant 0 : i32
    %24 = arith.cmpi ne, %23, %c0_i32_17 : i32
    scf.if %24 {
      %c0_18 = arith.constant 0 : index
      %c0_19 = arith.constant 0 : index
      %25 = vector.load %arg8[%c0_18, %c0_19] : memref<8x1xf32, #tpu.memory_space<vmem>>, vector<8x1xf32>
      %cst_20 = arith.constant 0.001953125 : f32
      %26 = vector.broadcast %cst_20 : f32 to vector<8x1xf32>
      %27 = arith.mulf %25, %26 : vector<8x1xf32>
      %c0_21 = arith.constant 0 : index
      %c0_22 = arith.constant 0 : index
      %28 = vector.load %arg9[%c0_21, %c0_22] : memref<8x1xf32, #tpu.memory_space<vmem>>, vector<8x1xf32>
      %cst_23 = arith.constant 0.001953125 : f32
      %29 = vector.broadcast %cst_23 : f32 to vector<8x1xf32>
      %30 = arith.mulf %28, %29 : vector<8x1xf32>
      %31 = arith.mulf %27, %27 : vector<8x1xf32>
      %32 = arith.subf %30, %31 : vector<8x1xf32>
      %c0_24 = arith.constant 0 : index
      %c0_25 = arith.constant 0 : index
      %33 = vector.load %arg4[%c0_24, %c0_25] : memref<8x1xf32, #tpu.memory_space<vmem>>, vector<8x1xf32>
      %cst_26 = arith.constant 9.99999974E-6 : f32
      %34 = vector.broadcast %cst_26 : f32 to vector<8x1xf32>
      %35 = arith.addf %32, %34 : vector<8x1xf32>
      %36 = math.rsqrt %35 : vector<8x1xf32>
      %37 = arith.mulf %33, %36 : vector<8x1xf32>
      %c0_27 = arith.constant 0 : index
      %c0_28 = arith.constant 0 : index
      %38 = vector.load %arg6[%c0_27, %c0_28] : memref<8x1xf32, #tpu.memory_space<vmem>>, vector<8x1xf32>
      tpu.vector_store %arg6[%c0_27, %c0_28], %37 {strides = array<i32>} : memref<8x1xf32, #tpu.memory_space<vmem>>, vector<8x1xf32>,
      %c0_29 = arith.constant 0 : index
      %c0_30 = arith.constant 0 : index
      %39 = vector.load %arg5[%c0_29, %c0_30] : memref<8x1xf32, #tpu.memory_space<vmem>>, vector<8x1xf32>
      %40 = arith.mulf %27, %37 : vector<8x1xf32>
      %41 = arith.subf %39, %40 : vector<8x1xf32>
      %c0_31 = arith.constant 0 : index
      %c0_32 = arith.constant 0 : index
      %42 = vector.load %arg7[%c0_31, %c0_32] : memref<8x1xf32, #tpu.memory_space<vmem>>, vector<8x1xf32>
      tpu.vector_store %arg7[%c0_31, %c0_32], %41 {strides = array<i32>} : memref<8x1xf32, #tpu.memory_space<vmem>>, vector<8x1xf32>,
    } else {
    }
    return
  }
  func.func @transform_0(%arg0: i32, %arg1: i32) -> (i32, i32, i32) {
    %c0_i32 = arith.constant 0 : i32
    %c0_i32_0 = arith.constant 0 : i32
    return %arg0, %c0_i32, %arg1 : i32, i32, i32
  }
  func.func @transform_1(%arg0: i32, %arg1: i32) -> (i32, i32) {
    %c0_i32 = arith.constant 0 : i32
    %c0_i32_0 = arith.constant 0 : i32
    %c0_i32_1 = arith.constant 0 : i32
    return %c0_i32, %c0_i32_0 : i32, i32
  }
  func.func @transform_2(%arg0: i32, %arg1: i32) -> (i32, i32) {
    %c0_i32 = arith.constant 0 : i32
    %c0_i32_0 = arith.constant 0 : i32
    %c0_i32_1 = arith.constant 0 : i32
    return %c0_i32, %c0_i32_0 : i32, i32
  }
  func.func @transform_3(%arg0: i32, %arg1: i32) -> (i32, i32) {
    %c0_i32 = arith.constant 0 : i32
    %c0_i32_0 = arith.constant 0 : i32
    %c0_i32_1 = arith.constant 0 : i32
    return %c0_i32, %c0_i32_0 : i32, i32
  }
  func.func @transform_4(%arg0: i32, %arg1: i32) -> (i32, i32) {
    %c0_i32 = arith.constant 0 : i32
    %c0_i32_0 = arith.constant 0 : i32
    %c0_i32_1 = arith.constant 0 : i32
    return %c0_i32, %c0_i32_0 : i32, i32
  }
  func.func @transform_5(%arg0: i32, %arg1: i32) -> (i32, i32) {
    %c0_i32 = arith.constant 0 : i32
    %c0_i32_0 = arith.constant 0 : i32
    %c0_i32_1 = arith.constant 0 : i32
    return %c0_i32, %c0_i32_0 : i32, i32
  }
}

</mosaic_0001>

<bundles_post_ra>
// kernel: tpu_custom_call.1
= control target key start
LH: loop header
LB: loop body
LE: loop exit
PB: predicated region body
PF: predicated region fallthrough
CT: control target
= control target key end

     0   :  { %s513_s18 = smov 0   ;;  %s515_s19 = smov 0   ;;  %s568_s0 = inlined_call_operand.vmem [shape: f32[2,4,256], index: 0, kind: input, shape index: {}]   ;;  %s569_s1 = inlined_call_operand.vmem [shape: f32[8,4], index: 1, kind: input, shape index: {}]   ;;  %s570_s2 = inlined_call_operand.vmem [shape: f32[8,1], index: 2, kind: input, shape index: {}]   ;;  %s571_s3 = inlined_call_operand.vmem [shape: f32[8,1], index: 3, kind: input, shape index: {}]   ;;  %s572_s4 = inlined_call_operand.vmem [shape: f32[8,1], index: 4, kind: output, shape index: {0}]   ;;  %s573_s5 = inlined_call_operand.vmem [shape: f32[8,1], index: 5, kind: output, shape index: {1}]  }
   0x1   :  { %s517_s20 = smov 0  }
   0x2 LB: > { %s28_s21 = sadd.s32 1, %s475_s19  ;;  %p415_p0 = scmp.ge.s32.totalorder %s479_s20, 1  ;;  %s479_s20 = sphi %s517_s20, %s16_s20   ;;  %s475_s19 = sphi %s515_s19, %s575_s19   ;;  %s471_s18 = sphi %s513_s18, %s574_s18  }
   0x3   : > { %p30_p1 = scmp.ge.s32.totalorder %s28_s21, 2  ;;  %p199_p2 = scmp.lt.s32.totalorder %s479_s20, 3 }
   0x5   : > { %s577_s21 = smov (%p30_p1, %s28_s21), 0  ;;  %p200_p3 = pnand %p415_p0, %p199_p2 }
   0x6   : > { %p227_p4 = scmp.lt.s32.totalorder (!%p200_p3), %s471_s18, 1  ;;  %p236_p5 = scmp.eq.s32.totalorder (!%p200_p3), %s471_s18, 0 }
   0x7   : > { %203 = sbr.rel (%p200_p3) target bundleno = 399 (0x18f), region = 36 }
   0xc   : > { %s228_s22 = scalar_select %p227_p4, %s471_s18, 1  ;;  %vm242_vm0 = vcmask (%p236_p5), 7168   ;;  %v481_v0 = vmov (%p236_p5), 0.0  }
   0xd   : > { %241 = sbr.rel (!%p236_p5) target bundleno = 18 (0x12), region = 40  ;;  %243 = vst.msk [vmem:[#allocation2] sm:$0xff] (%p236_p5), %vm242_vm0, %v481_v0  ;;  %244 = vst.msk [vmem:[#allocation3] sm:$0xff] (%p236_p5), %vm242_vm0, %v481_v0 }
   0xe   : > { %s425_s23 = sshll.u32 %s228_s22, 3 }
   0xf   : > { %s234_s26 = scalar_lea.vmem %s568_s0, %s425_s23 }
  0x12 PF: > { %v246_v1 = vld [vmem:[%s234_s26] sm:$0xff]  ;;  %vm253_vm1 = vcmask 1043456   ;;  %v482_v3 = vmov 0.0   ;;  %vm249_vm2 = vcmask 31744   ;;  %p344_p6 = scmp.eq.s32.totalorder %s471_s18, 1  ;;  %vm334_vm3 = vcmask 7168  }
  0x13   : > { %v248_v2 = vcombine.high %v246_v1, %v246_v1  ;;  %322 = vmatprep.mubr.f32.mxu0 %v482_v3  ;;  %v245_v4 = vld [vmem:[%s569_s1] sm:$0xff] }
  0x14   : > { %v329_v11 = vld [vmem:[#allocation2] sm:$0xff]  ;;  %v336_v14 = vld [vmem:[#allocation3] sm:$0xff] }
  0x15   : > { %419 = vmatprep.subr.msk.mxu0 %vm253_vm1, %v248_v2  ;;  %v355_v24 = vld [vmem:[%s570_s2] sm:$0xff] (%p344_p6) }
  0x16   : > { %420 = vmatpush1.msk.msra.mxu0 %vm253_vm1, %v246_v1  ;;  %v360_v27 = vld [vmem:[%s571_s3] sm:$0xff] (%p344_p6) }
  0x17   : > { %421 = vmatmul.mubr.msk.f32.vlgmr.msra.gmra.mxu0 %vm249_vm2, %v245_v4 }
  0xd7   : > { %v324_v5 = vpop.f32.mrf.mxu0 }
  0xd8   : > { %v337_v9 = vmul.f32 %v324_v5, %v324_v5 }
  0xd9   : > { %v326_v6 = vpop.f32.mrf.mxu0 }
  0xda   : > { %v338_v7 = vmul.f32 %v326_v6, %v326_v6  ;;  %v330_v8 = vadd.f32 %v326_v6, %v324_v5 }
  0xdc   : > { %331 = vadd.xlane.f32.xlu0 %v330_v8  ;;  %v339_v10 = vadd.f32 %v338_v7, %v337_v9 }
  0xe0   : > { %340 = vadd.xlane.f32.xlu0 %v339_v10 }
 0x165   : > { %v332_v12 = vpop.xlane.xlu0 %331 }
 0x166   : > { %v333_v13 = vadd.f32 %v332_v12, %v329_v11 }
 0x168   : > { %335 = vst.msk [vmem:[#allocation2] sm:$0xff] %vm334_vm3, %v333_v13  ;;  %348 = sbr.rel (!%p344_p6) target bundleno = 399 (0x18f), region = 44 }
 0x169   : > { %v341_v15 = vpop.xlane.xlu0 %340 }
 0x16a   : > { %v342_v16 = vadd.f32 %v341_v15, %v336_v14 }
 0x16c   : > { %343 = vst.msk [vmem:[#allocation3] sm:$0xff] %vm334_vm3, %v342_v16 }
 0x16f   : > { %v349_v17 = vld [vmem:[#allocation2] sm:$0xff] }
 0x170   : > { %v350_v19 = vmul.f32 0.001953125, %v349_v17 }
 0x172   : > { %v353_v21 = vmul.f32 %v350_v19, %v350_v19 }
 0x173   : > { %v351_v18 = vld [vmem:[#allocation3] sm:$0xff] }
 0x174   : > { %v352_v20 = vmul.f32 0.001953125, %v351_v18 }
 0x176   : > { %v354_v22 = vsub.f32 %v352_v20, %v353_v21 }
 0x178   : > { %v356_v23 = vadd.f32 1e-05, %v354_v22 }
 0x17a   : > { %455 = vrsqrt.f32 %v356_v23 }
 0x187   : > { %v456_v25 = vpop.eup %455 }
 0x188   : > { %v358_v26 = vmul.f32 %v456_v25, %v355_v24 }
 0x18a   : > { %359 = vst.msk [vmem:[%s572_s4] sm:$0xff] %vm334_vm3, %v358_v26  ;;  %v361_v28 = vmul.f32 %v358_v26, %v350_v19 }
 0x18c   : > { %v362_v29 = vsub.f32 %v360_v27, %v361_v28 }
 0x18e   : > { %363 = vst.msk [vmem:[%s573_s5] sm:$0xff] %vm334_vm3, %v362_v29 }
 0x18f PF: > { %s16_s20 = sadd.s32 1, %s479_s20   ;;  %s574_s18 = smov %s475_s19 }
 0x190   : > { %p13_p7 = scmp.ge.s32.totalorder %s16_s20, 4   ;;  %s575_s19 = smov %s577_s21 }
 0x192   :  { %15 = sbr.rel (!%p13_p7) target bundleno = 2 (0x2), region = 78 }

</bundles_post_ra>
